<compile_context>
chip_gen: v7x
topology: tpu7x:2x2x1
jax: 0.10.0
libtpu: 0.0.40
codegen_flags: <defaults>
</compile_context>

<pallas_src>
import jax
import jax.numpy as jnp
import numpy as np
from jax.experimental import pallas as pl
from jax.experimental.pallas import tpu as pltpu


def _spectral_mix_kernel(ar_ref, ai_ref, wr_ref, wi_ref, or_ref, oi_ref):
    """Complex per-mode channel mixing in native (B, C, freq) layout.

    ar/ai : (TB, Cin, modes1)    real / imag of x_ft, first modes1 modes
    wr/wi : (Cin, Cout, modes1)  real / imag of weights1
    or/oi : (TB, Cout, n_freq)   real / imag of the FULL out_ft (tail modes zeroed)

    out[b, o, m] = sum_i a[b, i, m] * w[i, o, m]   (complex), i.e.
      out_re = sum_i ar*wr - ai*wi
      out_im = sum_i ai*wr + ar*wi
    """
    ar = ar_ref[...]
    ai = ai_ref[...]
    wr = wr_ref[...]
    wi = wi_ref[...]

    tb, cin, m = ar.shape
    cout = wr.shape[1]

    acc_re = jnp.zeros((tb, cout, m), jnp.float32)
    acc_im = jnp.zeros((tb, cout, m), jnp.float32)

    # Static, unrolled VPU multiply-accumulate over input channels (Cin is small).
    for i in range(cin):
        a_r = ar[:, i : i + 1, :]        # (TB, 1, M)
        a_i = ai[:, i : i + 1, :]
        w_r = wr[i][None, :, :]          # (1, Cout, M)
        w_i = wi[i][None, :, :]
        acc_re = acc_re + (a_r * w_r - a_i * w_i)
        acc_im = acc_im + (a_i * w_r + a_r * w_i)

    # Write the full spectral buffer: zero everything, then overwrite the low modes.
    # This removes the wrapper-side zeros + .at[...].set(...) HBM pass.
    or_ref[...] = jnp.zeros_like(or_ref)
    oi_ref[...] = jnp.zeros_like(oi_ref)
    or_ref[:, :, :m] = acc_re
    oi_ref[:, :, :m] = acc_im


def compl_mul1d_pallas(a_re, a_im, w_re, w_im, n_freq):
    """a_*: (B, Cin, modes1), w_*: (Cin, Cout, modes1) -> (B, Cout, n_freq) (re, im)."""
    B, Cin, M = a_re.shape
    _, Cout, _ = w_re.shape
    assert M <= n_freq

    # Batch tile that divides B exactly (no ragged edge handling needed).
    TB = next(t for t in (8, 4, 2, 1) if B % t == 0)
    grid = (B // TB,)

    in_specs = [
        pl.BlockSpec((TB, Cin, M), lambda b: (b, 0, 0)),       # x_ft real
        pl.BlockSpec((TB, Cin, M), lambda b: (b, 0, 0)),       # x_ft imag
        pl.BlockSpec((Cin, Cout, M), lambda b: (0, 0, 0)),     # weights real (broadcast)
        pl.BlockSpec((Cin, Cout, M), lambda b: (0, 0, 0)),     # weights imag (broadcast)
    ]
    out_specs = (
        pl.BlockSpec((TB, Cout, n_freq), lambda b: (b, 0, 0)),
        pl.BlockSpec((TB, Cout, n_freq), lambda b: (b, 0, 0)),
    )
    out_shape = (
        jax.ShapeDtypeStruct((B, Cout, n_freq), jnp.float32),
        jax.ShapeDtypeStruct((B, Cout, n_freq), jnp.float32),
    )

    return pl.pallas_call(
        _spectral_mix_kernel,
        grid=grid,
        in_specs=in_specs,
        out_specs=out_specs,
        out_shape=out_shape,
        compiler_params=pltpu.CompilerParams(
            dimension_semantics=("parallel",),   # megacore sharding over batch tiles (v7x)
        ),
    )(
        a_re.astype(jnp.float32),
        a_im.astype(jnp.float32),
        w_re.astype(jnp.float32),
        w_im.astype(jnp.float32),
    )


def spectral_conv1d(x, weights1, modes1):
    """x: (B, Cin, N) float32, weights1: (Cin, Cout, modes1, 2) float32."""
    B, Cin, N = x.shape
    _, Cout, _, _ = weights1.shape
    # PyTorch code allocates out_ft with in_channels, so it only works if Cin == Cout.
    assert Cin == Cout, "SpectralConv1d reference requires in_channels == out_channels"

    n_freq = N // 2 + 1

    # rfft, normalized=True, onesided=True  <=>  norm='ortho'
    x_ft = jnp.fft.rfft(x.astype(jnp.float32), axis=-1, norm="ortho")  # (B, Cin, n_freq) c64
    a_re = jnp.real(x_ft[:, :, :modes1])
    a_im = jnp.imag(x_ft[:, :, :modes1])

    w_re = weights1[..., 0]
    w_im = weights1[..., 1]

    # Kernel produces the full spectral buffer (tail modes already zero).
    o_re, o_im = compl_mul1d_pallas(a_re, a_im, w_re, w_im, n_freq)  # (B, Cout, n_freq)
    out_ft = jax.lax.complex(o_re, o_im)

    # irfft, normalized=True, onesided=True, signal_sizes=(N,)  <=>  norm='ortho'
    return jnp.fft.irfft(out_ft, n=N, axis=-1, norm="ortho").astype(jnp.float32)


def _reference(x, weights1, modes1):
    """Pure-JAX reference of the PyTorch forward, for verification."""
    B, Cin, N = x.shape
    Cout = weights1.shape[1]
    x_ft = jnp.fft.rfft(x, axis=-1, norm="ortho")
    w = weights1[..., 0] + 1j * weights1[..., 1]                        # (Cin, Cout, M)
    out_modes = jnp.einsum("bix,iox->box", x_ft[:, :, :modes1], w)      # (B, Cout, M)
    out_ft = jnp.zeros((B, Cout, N // 2 + 1), dtype=jnp.complex64)
    out_ft = out_ft.at[:, :, :modes1].set(out_modes)
    return jnp.fft.irfft(out_ft, n=N, axis=-1, norm="ortho")


if __name__ == "__main__":
    # Small shapes consistent with the module.
    B, Cin, Cout, N, modes1 = 2, 4, 4, 16, 6

    key = jax.random.PRNGKey(0)
    kx, kw = jax.random.split(key)

    x = jax.random.normal(kx, (B, Cin, N), dtype=jnp.float32)

    # Deterministic parameter init matching nn.Parameter(scale * torch.rand(Cin, Cout, modes1, 2))
    scale = 1.0 / (Cin * Cout)
    weights1 = scale * jax.random.uniform(kw, (Cin, Cout, modes1, 2), dtype=jnp.float32)

    out = spectral_conv1d(x, weights1, modes1)
    out = jax.block_until_ready(out)

    ref = jax.block_until_ready(_reference(x, weights1, modes1))
    np.testing.assert_allclose(np.asarray(out), np.asarray(ref), rtol=1e-5, atol=1e-5)

    print("KERNEL_OK")
</pallas_src>

<mosaic_0001>
module attributes {stable_mosaic.version = 11 : i64} {
  func.func @_spectral_mix_kernel(%arg0: i32, %arg1: memref<2x4x6xf32, #tpu.memory_space<vmem>>, %arg2: memref<2x4x6xf32, #tpu.memory_space<vmem>>, %arg3: memref<4x4x6xf32, #tpu.memory_space<vmem>>, %arg4: memref<4x4x6xf32, #tpu.memory_space<vmem>>, %arg5: memref<2x4x9xf32, #tpu.memory_space<vmem>>, %arg6: memref<2x4x9xf32, #tpu.memory_space<vmem>>) attributes {dimension_semantics = [#tpu.dimension_semantics<parallel>], iteration_bounds = array<i64: 1>, scalar_prefetch = 0 : i64, scratch_operands = 0 : i64, tpu.core_type = #tpu.core_type<tc>, window_params = [{transform_indices = @transform_0, window_bounds = array<i64: 2, 4, 6>}, {transform_indices = @transform_1, window_bounds = array<i64: 2, 4, 6>}, {pipeline_mode = #tpu.pipeline_mode<synchronous>, transform_indices = @transform_2, window_bounds = array<i64: 4, 4, 6>}, {pipeline_mode = #tpu.pipeline_mode<synchronous>, transform_indices = @transform_3, window_bounds = array<i64: 4, 4, 6>}, {transform_indices = @transform_4, window_bounds = array<i64: 2, 4, 9>}, {transform_indices = @transform_5, window_bounds = array<i64: 2, 4, 9>}]} {
    %c0 = arith.constant 0 : index
    %c0_0 = arith.constant 0 : index
    %c0_1 = arith.constant 0 : index
    %0 = vector.load %arg1[%c0, %c0_0, %c0_1] : memref<2x4x6xf32, #tpu.memory_space<vmem>>, vector<2x4x6xf32>
    %c0_2 = arith.constant 0 : index
    %c0_3 = arith.constant 0 : index
    %c0_4 = arith.constant 0 : index
    %1 = vector.load %arg2[%c0_2, %c0_3, %c0_4] : memref<2x4x6xf32, #tpu.memory_space<vmem>>, vector<2x4x6xf32>
    %c0_5 = arith.constant 0 : index
    %c0_6 = arith.constant 0 : index
    %c0_7 = arith.constant 0 : index
    %2 = vector.load %arg3[%c0_5, %c0_6, %c0_7] : memref<4x4x6xf32, #tpu.memory_space<vmem>>, vector<4x4x6xf32>
    %c0_8 = arith.constant 0 : index
    %c0_9 = arith.constant 0 : index
    %c0_10 = arith.constant 0 : index
    %3 = vector.load %arg4[%c0_8, %c0_9, %c0_10] : memref<4x4x6xf32, #tpu.memory_space<vmem>>, vector<4x4x6xf32>
    %cst = arith.constant 0.000000e+00 : f32
    %4 = vector.broadcast %cst : f32 to vector<2x4x6xf32>
    %cst_11 = arith.constant 0.000000e+00 : f32
    %5 = vector.broadcast %cst_11 : f32 to vector<2x4x6xf32>
    %6 = vector.extract_strided_slice %0 {offsets = [0, 0, 0], sizes = [2, 1, 6], strides = [1, 1, 1]} : vector<2x4x6xf32> to vector<2x1x6xf32>
    %7 = vector.extract_strided_slice %1 {offsets = [0, 0, 0], sizes = [2, 1, 6], strides = [1, 1, 1]} : vector<2x4x6xf32> to vector<2x1x6xf32>
    %8 = vector.extract_strided_slice %2 {offsets = [0, 0, 0], sizes = [1, 4, 6], strides = [1, 1, 1]} : vector<4x4x6xf32> to vector<1x4x6xf32>
    %9 = vector.shape_cast %8 : vector<1x4x6xf32> to vector<4x6xf32>
    %10 = vector.shape_cast %9 : vector<4x6xf32> to vector<1x4x6xf32>
    %11 = vector.extract_strided_slice %3 {offsets = [0, 0, 0], sizes = [1, 4, 6], strides = [1, 1, 1]} : vector<4x4x6xf32> to vector<1x4x6xf32>
    %12 = vector.shape_cast %11 : vector<1x4x6xf32> to vector<4x6xf32>
    %13 = vector.shape_cast %12 : vector<4x6xf32> to vector<1x4x6xf32>
    %14 = vector.broadcast %6 : vector<2x1x6xf32> to vector<2x4x6xf32>
    %15 = vector.broadcast %10 : vector<1x4x6xf32> to vector<2x4x6xf32>
    %16 = arith.mulf %14, %15 : vector<2x4x6xf32>
    %17 = vector.broadcast %7 : vector<2x1x6xf32> to vector<2x4x6xf32>
    %18 = vector.broadcast %13 : vector<1x4x6xf32> to vector<2x4x6xf32>
    %19 = arith.mulf %17, %18 : vector<2x4x6xf32>
    %20 = arith.subf %16, %19 : vector<2x4x6xf32>
    %21 = arith.addf %4, %20 : vector<2x4x6xf32>
    %22 = vector.broadcast %7 : vector<2x1x6xf32> to vector<2x4x6xf32>
    %23 = vector.broadcast %10 : vector<1x4x6xf32> to vector<2x4x6xf32>
    %24 = arith.mulf %22, %23 : vector<2x4x6xf32>
    %25 = vector.broadcast %6 : vector<2x1x6xf32> to vector<2x4x6xf32>
    %26 = vector.broadcast %13 : vector<1x4x6xf32> to vector<2x4x6xf32>
    %27 = arith.mulf %25, %26 : vector<2x4x6xf32>
    %28 = arith.addf %24, %27 : vector<2x4x6xf32>
    %29 = arith.addf %5, %28 : vector<2x4x6xf32>
    %30 = vector.extract_strided_slice %0 {offsets = [0, 1, 0], sizes = [2, 1, 6], strides = [1, 1, 1]} : vector<2x4x6xf32> to vector<2x1x6xf32>
    %31 = vector.extract_strided_slice %1 {offsets = [0, 1, 0], sizes = [2, 1, 6], strides = [1, 1, 1]} : vector<2x4x6xf32> to vector<2x1x6xf32>
    %32 = vector.extract_strided_slice %2 {offsets = [1, 0, 0], sizes = [1, 4, 6], strides = [1, 1, 1]} : vector<4x4x6xf32> to vector<1x4x6xf32>
    %33 = vector.shape_cast %32 : vector<1x4x6xf32> to vector<4x6xf32>
    %34 = vector.shape_cast %33 : vector<4x6xf32> to vector<1x4x6xf32>
    %35 = vector.extract_strided_slice %3 {offsets = [1, 0, 0], sizes = [1, 4, 6], strides = [1, 1, 1]} : vector<4x4x6xf32> to vector<1x4x6xf32>
    %36 = vector.shape_cast %35 : vector<1x4x6xf32> to vector<4x6xf32>
    %37 = vector.shape_cast %36 : vector<4x6xf32> to vector<1x4x6xf32>
    %38 = vector.broadcast %30 : vector<2x1x6xf32> to vector<2x4x6xf32>
    %39 = vector.broadcast %34 : vector<1x4x6xf32> to vector<2x4x6xf32>
    %40 = arith.mulf %38, %39 : vector<2x4x6xf32>
    %41 = vector.broadcast %31 : vector<2x1x6xf32> to vector<2x4x6xf32>
    %42 = vector.broadcast %37 : vector<1x4x6xf32> to vector<2x4x6xf32>
    %43 = arith.mulf %41, %42 : vector<2x4x6xf32>
    %44 = arith.subf %40, %43 : vector<2x4x6xf32>
    %45 = arith.addf %21, %44 : vector<2x4x6xf32>
    %46 = vector.broadcast %31 : vector<2x1x6xf32> to vector<2x4x6xf32>
    %47 = vector.broadcast %34 : vector<1x4x6xf32> to vector<2x4x6xf32>
    %48 = arith.mulf %46, %47 : vector<2x4x6xf32>
    %49 = vector.broadcast %30 : vector<2x1x6xf32> to vector<2x4x6xf32>
    %50 = vector.broadcast %37 : vector<1x4x6xf32> to vector<2x4x6xf32>
    %51 = arith.mulf %49, %50 : vector<2x4x6xf32>
    %52 = arith.addf %48, %51 : vector<2x4x6xf32>
    %53 = arith.addf %29, %52 : vector<2x4x6xf32>
    %54 = vector.extract_strided_slice %0 {offsets = [0, 2, 0], sizes = [2, 1, 6], strides = [1, 1, 1]} : vector<2x4x6xf32> to vector<2x1x6xf32>
    %55 = vector.extract_strided_slice %1 {offsets = [0, 2, 0], sizes = [2, 1, 6], strides = [1, 1, 1]} : vector<2x4x6xf32> to vector<2x1x6xf32>
    %56 = vector.extract_strided_slice %2 {offsets = [2, 0, 0], sizes = [1, 4, 6], strides = [1, 1, 1]} : vector<4x4x6xf32> to vector<1x4x6xf32>
    %57 = vector.shape_cast %56 : vector<1x4x6xf32> to vector<4x6xf32>
    %58 = vector.shape_cast %57 : vector<4x6xf32> to vector<1x4x6xf32>
    %59 = vector.extract_strided_slice %3 {offsets = [2, 0, 0], sizes = [1, 4, 6], strides = [1, 1, 1]} : vector<4x4x6xf32> to vector<1x4x6xf32>
    %60 = vector.shape_cast %59 : vector<1x4x6xf32> to vector<4x6xf32>
    %61 = vector.shape_cast %60 : vector<4x6xf32> to vector<1x4x6xf32>
    %62 = vector.broadcast %54 : vector<2x1x6xf32> to vector<2x4x6xf32>
    %63 = vector.broadcast %58 : vector<1x4x6xf32> to vector<2x4x6xf32>
    %64 = arith.mulf %62, %63 : vector<2x4x6xf32>
    %65 = vector.broadcast %55 : vector<2x1x6xf32> to vector<2x4x6xf32>
    %66 = vector.broadcast %61 : vector<1x4x6xf32> to vector<2x4x6xf32>
    %67 = arith.mulf %65, %66 : vector<2x4x6xf32>
    %68 = arith.subf %64, %67 : vector<2x4x6xf32>
    %69 = arith.addf %45, %68 : vector<2x4x6xf32>
    %70 = vector.broadcast %55 : vector<2x1x6xf32> to vector<2x4x6xf32>
    %71 = vector.broadcast %58 : vector<1x4x6xf32> to vector<2x4x6xf32>
    %72 = arith.mulf %70, %71 : vector<2x4x6xf32>
    %73 = vector.broadcast %54 : vector<2x1x6xf32> to vector<2x4x6xf32>
    %74 = vector.broadcast %61 : vector<1x4x6xf32> to vector<2x4x6xf32>
    %75 = arith.mulf %73, %74 : vector<2x4x6xf32>
    %76 = arith.addf %72, %75 : vector<2x4x6xf32>
    %77 = arith.addf %53, %76 : vector<2x4x6xf32>
    %78 = vector.extract_strided_slice %0 {offsets = [0, 3, 0], sizes = [2, 1, 6], strides = [1, 1, 1]} : vector<2x4x6xf32> to vector<2x1x6xf32>
    %79 = vector.extract_strided_slice %1 {offsets = [0, 3, 0], sizes = [2, 1, 6], strides = [1, 1, 1]} : vector<2x4x6xf32> to vector<2x1x6xf32>
    %80 = vector.extract_strided_slice %2 {offsets = [3, 0, 0], sizes = [1, 4, 6], strides = [1, 1, 1]} : vector<4x4x6xf32> to vector<1x4x6xf32>
    %81 = vector.shape_cast %80 : vector<1x4x6xf32> to vector<4x6xf32>
    %82 = vector.shape_cast %81 : vector<4x6xf32> to vector<1x4x6xf32>
    %83 = vector.extract_strided_slice %3 {offsets = [3, 0, 0], sizes = [1, 4, 6], strides = [1, 1, 1]} : vector<4x4x6xf32> to vector<1x4x6xf32>
    %84 = vector.shape_cast %83 : vector<1x4x6xf32> to vector<4x6xf32>
    %85 = vector.shape_cast %84 : vector<4x6xf32> to vector<1x4x6xf32>
    %86 = vector.broadcast %78 : vector<2x1x6xf32> to vector<2x4x6xf32>
    %87 = vector.broadcast %82 : vector<1x4x6xf32> to vector<2x4x6xf32>
    %88 = arith.mulf %86, %87 : vector<2x4x6xf32>
    %89 = vector.broadcast %79 : vector<2x1x6xf32> to vector<2x4x6xf32>
    %90 = vector.broadcast %85 : vector<1x4x6xf32> to vector<2x4x6xf32>
    %91 = arith.mulf %89, %90 : vector<2x4x6xf32>
    %92 = arith.subf %88, %91 : vector<2x4x6xf32>
    %93 = arith.addf %69, %92 : vector<2x4x6xf32>
    %94 = vector.broadcast %79 : vector<2x1x6xf32> to vector<2x4x6xf32>
    %95 = vector.broadcast %82 : vector<1x4x6xf32> to vector<2x4x6xf32>
    %96 = arith.mulf %94, %95 : vector<2x4x6xf32>
    %97 = vector.broadcast %78 : vector<2x1x6xf32> to vector<2x4x6xf32>
    %98 = vector.broadcast %85 : vector<1x4x6xf32> to vector<2x4x6xf32>
    %99 = arith.mulf %97, %98 : vector<2x4x6xf32>
    %100 = arith.addf %96, %99 : vector<2x4x6xf32>
    %101 = arith.addf %77, %100 : vector<2x4x6xf32>
    %cst_12 = arith.constant 0.000000e+00 : f32
    %102 = vector.broadcast %cst_12 : f32 to vector<2x4x9xf32>
    %c0_13 = arith.constant 0 : index
    %c0_14 = arith.constant 0 : index
    %c0_15 = arith.constant 0 : index
    %103 = vector.load %arg5[%c0_13, %c0_14, %c0_15] : memref<2x4x9xf32, #tpu.memory_space<vmem>>, vector<2x4x9xf32>
    tpu.vector_store %arg5[%c0_13, %c0_14, %c0_15], %102 {strides = array<i32>} : memref<2x4x9xf32, #tpu.memory_space<vmem>>, vector<2x4x9xf32>,
    %cst_16 = arith.constant 0.000000e+00 : f32
    %104 = vector.broadcast %cst_16 : f32 to vector<2x4x9xf32>
    %c0_17 = arith.constant 0 : index
    %c0_18 = arith.constant 0 : index
    %c0_19 = arith.constant 0 : index
    %105 = vector.load %arg6[%c0_17, %c0_18, %c0_19] : memref<2x4x9xf32, #tpu.memory_space<vmem>>, vector<2x4x9xf32>
    tpu.vector_store %arg6[%c0_17, %c0_18, %c0_19], %104 {strides = array<i32>} : memref<2x4x9xf32, #tpu.memory_space<vmem>>, vector<2x4x9xf32>,
    %c0_20 = arith.constant 0 : index
    %c0_21 = arith.constant 0 : index
    %c0_22 = arith.constant 0 : index
    %106 = vector.load %arg5[%c0_20, %c0_21, %c0_22] : memref<2x4x9xf32, #tpu.memory_space<vmem>>, vector<2x4x6xf32>
    tpu.vector_store %arg5[%c0_20, %c0_21, %c0_22], %93 {strides = array<i32>} : memref<2x4x9xf32, #tpu.memory_space<vmem>>, vector<2x4x6xf32>,
    %c0_23 = arith.constant 0 : index
    %c0_24 = arith.constant 0 : index
    %c0_25 = arith.constant 0 : index
    %107 = vector.load %arg6[%c0_23, %c0_24, %c0_25] : memref<2x4x9xf32, #tpu.memory_space<vmem>>, vector<2x4x6xf32>
    tpu.vector_store %arg6[%c0_23, %c0_24, %c0_25], %101 {strides = array<i32>} : memref<2x4x9xf32, #tpu.memory_space<vmem>>, vector<2x4x6xf32>,
    return
  }
  func.func @transform_0(%arg0: i32) -> (i32, i32, i32) {
    %c0_i32 = arith.constant 0 : i32
    %c0_i32_0 = arith.constant 0 : i32
    %c0_i32_1 = arith.constant 0 : i32
    return %arg0, %c0_i32, %c0_i32_0 : i32, i32, i32
  }
  func.func @transform_1(%arg0: i32) -> (i32, i32, i32) {
    %c0_i32 = arith.constant 0 : i32
    %c0_i32_0 = arith.constant 0 : i32
    %c0_i32_1 = arith.constant 0 : i32
    return %arg0, %c0_i32, %c0_i32_0 : i32, i32, i32
  }
  func.func @transform_2(%arg0: i32) -> (i32, i32, i32) {
    %c0_i32 = arith.constant 0 : i32
    %c0_i32_0 = arith.constant 0 : i32
    %c0_i32_1 = arith.constant 0 : i32
    %c0_i32_2 = arith.constant 0 : i32
    return %c0_i32, %c0_i32_0, %c0_i32_1 : i32, i32, i32
  }
  func.func @transform_3(%arg0: i32) -> (i32, i32, i32) {
    %c0_i32 = arith.constant 0 : i32
    %c0_i32_0 = arith.constant 0 : i32
    %c0_i32_1 = arith.constant 0 : i32
    %c0_i32_2 = arith.constant 0 : i32
    return %c0_i32, %c0_i32_0, %c0_i32_1 : i32, i32, i32
  }
  func.func @transform_4(%arg0: i32) -> (i32, i32, i32) {
    %c0_i32 = arith.constant 0 : i32
    %c0_i32_0 = arith.constant 0 : i32
    %c0_i32_1 = arith.constant 0 : i32
    return %arg0, %c0_i32, %c0_i32_0 : i32, i32, i32
  }
  func.func @transform_5(%arg0: i32) -> (i32, i32, i32) {
    %c0_i32 = arith.constant 0 : i32
    %c0_i32_0 = arith.constant 0 : i32
    %c0_i32_1 = arith.constant 0 : i32
    return %arg0, %c0_i32, %c0_i32_0 : i32, i32, i32
  }
}

</mosaic_0001>

<bundles_post_ra>
// kernel: tpu_custom_call.1
= control target key start
LH: loop header
LB: loop body
LE: loop exit
PB: predicated region body
PF: predicated region fallthrough
CT: control target
= control target key end

     0   :  { %11 = vsyncpa [#allocation3], 0  ;;  %s607_s0 = inlined_call_operand.hbm [shape: f32[2,4,6], index: 0, kind: input, shape index: {}]   ;;  %s608_s1 = inlined_call_operand.hbm [shape: f32[2,4,6], index: 1, kind: input, shape index: {}]   ;;  %s609_s2 = inlined_call_operand.hbm [shape: f32[4,4,6], index: 2, kind: input, shape index: {}]   ;;  %s610_s3 = inlined_call_operand.hbm [shape: f32[4,4,6], index: 3, kind: input, shape index: {}]   ;;  %s611_s4 = inlined_call_operand.hbm [shape: f32[2,4,9], index: 4, kind: output, shape index: {0}]   ;;  %s612_s5 = inlined_call_operand.hbm [shape: f32[2,4,9], index: 5, kind: output, shape index: {1}]  }
   0x1   :  { %12 = vsyncpa [#allocation6], 0 }
   0x2   :  { %13 = vsyncpa [#allocation9], 0 }
   0x3   :  { %14 = vsyncpa [#allocation4], 0 }
   0x4   :  { %15 = vsyncpa [#allocation12], 0  ;;  %s412_s18 = smov [#allocation5]   ;;  %s413_s20 = smov [#allocation2]  }
   0x5   :  { %s33_s19 = sshll.u32 %s412_s18, 4  ;;  %s21_s21 = sshll.u32 %s413_s20, 4  ;;  %s34_s19 = int_to_ptr.vmem [resolvable:$true] %s33_s19  ;;  %s451_s21 = int_to_ptr.vmem [resolvable:$true] %s21_s21 }
   0x6   :  { %s270_s24 = scalar_lea.hbm %s608_s1, 128 }
   0x7   :  { %p271_p0 = scmp.ne.s32.totalorder %s608_s1, %s270_s24  ;;  %p274_p1 = scmp.lt.u32.totalorder %s270_s24, %s608_s1 }
   0x9   :  { %p276_p2 = pnand %p274_p1, %p271_p0 }
   0xb   :  { %279 = shalt.err (!%p276_p2)
}
   0xc   :  { %s280_s29 = scalar_lea.vmem %s34_s19, 128  ;;  %p285_p4 = scmp.lt.s32.totalorder %s34_s19, %s34_s19 }
   0xd   :  { %p281_p3 = scmp.ne.s32.totalorder %s34_s19, %s280_s29  ;;  %p286_p5 = scmp.lt.s32.totalorder %s280_s29, %s280_s29 }
   0xf   :  { %p287_p6 = por %p286_p5, %p285_p4 }
  0x11   :  { %p288_p7 = pnand %p287_p6, %p281_p3 }
  0x13   :  { %291 = shalt.err (!%p288_p7)
}
  0x14   :  { %s414_s30 = smov 64   ;;  %s415_s6 = smov 4  }
  0x15   :  { %39 = dma.hbm_to_vmem [thread:$0]  %s608_s1, 128, %s34_s19, [#allocation6], %s414_s30, %s414_s30, %s415_s6  }
  0x16   :  { %s292_s11 = scalar_lea.hbm %s607_s0, 128 }
  0x17   :  { %p293_p8 = scmp.ne.s32.totalorder %s607_s0, %s292_s11  ;;  %p296_p9 = scmp.lt.u32.totalorder %s292_s11, %s607_s0 }
  0x19   :  { %p298_p10 = pnand %p296_p9, %p293_p8 }
  0x1b   :  { %301 = shalt.err (!%p298_p10)
}
  0x1c   :  { %s302_s16 = scalar_lea.vmem %s451_s21, 128  ;;  %p307_p12 = scmp.lt.s32.totalorder %s451_s21, %s451_s21 }
  0x1d   :  { %p303_p11 = scmp.ne.s32.totalorder %s451_s21, %s302_s16  ;;  %p308_p13 = scmp.lt.s32.totalorder %s302_s16, %s302_s16 }
  0x1f   :  { %p309_p0 = por %p308_p13, %p307_p12 }
  0x21   :  { %p310_p1 = pnand %p309_p0, %p303_p11 }
  0x23   :  { %313 = shalt.err (!%p310_p1)
}
  0x24   :  { %27 = dma.hbm_to_vmem [thread:$0]  %s607_s0, 128, %s451_s21, [#allocation3], %s414_s30, %s414_s30, %s415_s6  }
  0x25   :  { %s416_s18 = smov [#allocation7]   ;;  %s417_s20 = smov [#allocation8]  }
  0x26   :  { %s45_s19 = sshll.u32 %s416_s18, 4  ;;  %s57_s22 = sshll.u32 %s417_s20, 4  ;;  %s46_s19 = int_to_ptr.vmem [resolvable:$true] %s45_s19  ;;  %s488_s22 = int_to_ptr.vmem [resolvable:$true] %s57_s22 }
  0x27   :  { %s314_s25 = scalar_lea.hbm %s609_s2, 256 }
  0x28   :  { %p315_p2 = scmp.ne.s32.totalorder %s609_s2, %s314_s25  ;;  %p318_p3 = scmp.lt.u32.totalorder %s314_s25, %s609_s2 }
  0x2a   :  { %p320_p4 = pnand %p318_p3, %p315_p2 }
  0x2c   :  { %323 = shalt.err (!%p320_p4)
}
  0x2d   :  { %s324_s0 = scalar_lea.vmem %s46_s19, 256  ;;  %p329_p6 = scmp.lt.s32.totalorder %s46_s19, %s46_s19 }
  0x2e   :  { %p325_p5 = scmp.ne.s32.totalorder %s46_s19, %s324_s0  ;;  %p330_p7 = scmp.lt.s32.totalorder %s324_s0, %s324_s0 }
  0x30   :  { %p331_p8 = por %p330_p7, %p329_p6 }
  0x32   :  { %p332_p9 = pnand %p331_p8, %p325_p5 }
  0x34   :  { %335 = shalt.err (!%p332_p9)
}
  0x35   :  { %51 = dma.hbm_to_vmem [thread:$0]  %s609_s2, 256, %s46_s19, [#allocation6], %s414_s30, %s414_s30, %s415_s6  }
  0x36   :  { %s336_s10 = scalar_lea.hbm %s610_s3, 256 }
  0x37   :  { %p337_p10 = scmp.ne.s32.totalorder %s610_s3, %s336_s10  ;;  %p340_p11 = scmp.lt.u32.totalorder %s336_s10, %s610_s3 }
  0x39   :  { %p342_p12 = pnand %p340_p11, %p337_p10 }
  0x3b   :  { %345 = shalt.err (!%p342_p12)
}
  0x3c   :  { %s346_s15 = scalar_lea.vmem %s488_s22, 256  ;;  %p351_p0 = scmp.lt.s32.totalorder %s488_s22, %s488_s22 }
  0x3d   :  { %p347_p13 = scmp.ne.s32.totalorder %s488_s22, %s346_s15  ;;  %p352_p1 = scmp.lt.s32.totalorder %s346_s15, %s346_s15 }
  0x3f   :  { %p353_p2 = por %p352_p1, %p351_p0 }
  0x41   :  { %p354_p3 = pnand %p353_p2, %p347_p13 }
  0x43   :  { %357 = shalt.err (!%p354_p3)
}
  0x44   :  { %63 = dma.hbm_to_vmem [thread:$0]  %s610_s3, 256, %s488_s22, [#allocation9], %s414_s30, %s414_s30, %s415_s6  }
  0x45   :  { %402 = dma.done.wait [#allocation3], 128  }
  0x46   :  { %403 = vsyncadd [#allocation3], 4294967168 }
  0x47   :  { %404 = dma.done.wait [#allocation6], 384  }
  0x48   :  { %405 = vsyncadd [#allocation6], 4294966912 }
  0x49   :  { %406 = dma.done.wait [#allocation9], 256  }
  0x4a   :  { %407 = vsyncadd [#allocation9], 4294967040  ;;  %vm216_vm0 = vcmask 68608   ;;  %v88_v0 = vlaneseq  ;;  %v418_v1 = vmov 0.0   ;;  %v76_v7 = vld [vmem:[#allocation2] sm:$0xf] }
  0x4b   :  { %217 = vst.msk [vmem:[#allocation10] sm:$0xf] %vm216_vm0, %v418_v1  ;;  %218 = vst.msk [vmem:[#allocation10 + $0x4] sm:$0xf] %vm216_vm0, %v418_v1  ;;  %v78_v8 = vld [vmem:[#allocation5] sm:$0xf] }
  0x4c   :  { %219 = vst.msk [vmem:[#allocation11] sm:$0xf] %vm216_vm0, %v418_v1  ;;  %220 = vst.msk [vmem:[#allocation11 + $0x4] sm:$0xf] %vm216_vm0, %v418_v1  ;;  %v89_v2 = vshrl.u32 %v88_v0, 7  ;;  %vm221_vm1 = vcmask 44032  }
  0x4d   :  { %v525_v9 = vld [vmem:[#allocation7] sm:$0xf]  ;;  %v527_v10 = vld [vmem:[#allocation7 + $0x4] sm:$0xf]  ;;  %v529_v11 = vld [vmem:[#allocation7 + $0x8] sm:$0xf] }
  0x4e   :  { %v90_v3 = vsub.s32 0, %v89_v2  ;;  %v122_v4 = vsub.s32 1, %v89_v2  ;;  %v154_v5 = vsub.s32 2, %v89_v2  ;;  %v186_v6 = vsub.s32 3, %v89_v2  ;;  %v531_v12 = vld [vmem:[#allocation7 + $0xc] sm:$0xf] }
  0x4f   :  { %v533_v17 = vld [vmem:[#allocation8] sm:$0xf]  ;;  %v535_v18 = vld [vmem:[#allocation8 + $0x4] sm:$0xf]  ;;  %v537_v19 = vld [vmem:[#allocation8 + $0x8] sm:$0xf] }
  0x50   :  { %v91_v13 = vrot.slane %v76_v7, %v90_v3  ;;  %v101_v14 = vrot.slane %v78_v8, %v90_v3  ;;  %v123_v15 = vrot.slane %v76_v7, %v122_v4  ;;  %v133_v16 = vrot.slane %v78_v8, %v122_v4  ;;  %v539_v24 = vld [vmem:[#allocation8 + $0xc] sm:$0xf]  ;;  %v77_v29 = vld [vmem:[#allocation2 + $0x4] sm:$0xf]  ;;  %s419_s3 = smov [#allocation10]  }
  0x51   :  { %v155_v20 = vrot.slane %v76_v7, %v154_v5  ;;  %v165_v21 = vrot.slane %v78_v8, %v154_v5  ;;  %v187_v22 = vrot.slane %v76_v7, %v186_v6  ;;  %v197_v23 = vrot.slane %v78_v8, %v186_v6  ;;  %v79_v30 = vld [vmem:[#allocation5 + $0x4] sm:$0xf]  ;;  %s231_s1 = sshll.u32 %s419_s3, 4  ;;  %s232_s1 = int_to_ptr.vmem [resolvable:$true] %s231_s1 }
  0x52   :  { %v96_v25 = vmul.f32 %v91_v13, %v525_v9  ;;  %v106_v26 = vmul.f32 %v101_v14, %v533_v17  ;;  %v128_v27 = vmul.f32 %v123_v15, %v527_v10  ;;  %v138_v28 = vmul.f32 %v133_v16, %v535_v18  ;;  %s358_s17 = scalar_lea.vmem %s232_s1, 128  ;;  %p363_p5 = scmp.lt.s32.totalorder %s232_s1, %s232_s1 }
  0x53   :  { %v160_v31 = vmul.f32 %v155_v20, %v529_v11  ;;  %v170_v32 = vmul.f32 %v165_v21, %v537_v19  ;;  %v192_v33 = vmul.f32 %v187_v22, %v531_v12  ;;  %v202_v34 = vmul.f32 %v197_v23, %v539_v24  ;;  %p359_p4 = scmp.ne.s32.totalorder %s232_s1, %s358_s17  ;;  %p364_p6 = scmp.lt.s32.totalorder %s358_s17, %s358_s17 }
  0x54   :  { %v108_v35 = vsub.f32 %v96_v25, %v106_v26  ;;  %v140_v36 = vsub.f32 %v128_v27, %v138_v28  ;;  %v95_v37 = vrot.slane %v77_v29, %v90_v3  ;;  %v105_v38 = vrot.slane %v79_v30, %v90_v3 }
  0x55   :  { %v172_v39 = vsub.f32 %v160_v31, %v170_v32  ;;  %v204_v40 = vsub.f32 %v192_v33, %v202_v34  ;;  %v127_v41 = vrot.slane %v77_v29, %v122_v4  ;;  %v137_v42 = vrot.slane %v79_v30, %v122_v4  ;;  %p365_p7 = por %p364_p6, %p363_p5 }
  0x56   :  { %v142_v43 = vadd.f32 %v140_v36, %v108_v35  ;;  %v97_v44 = vmul.f32 %v95_v37, %v525_v9  ;;  %v107_v45 = vmul.f32 %v105_v38, %v533_v17  ;;  %v159_v46 = vrot.slane %v77_v29, %v154_v5 }
  0x57   :  { %v129_v47 = vmul.f32 %v127_v41, %v527_v10  ;;  %v139_v48 = vmul.f32 %v137_v42, %v535_v18  ;;  %v169_v49 = vrot.slane %v79_v30, %v154_v5  ;;  %v191_v50 = vrot.slane %v77_v29, %v186_v6  ;;  %p366_p8 = pnand %p365_p7, %p359_p4 }
  0x58   :  { %v174_v51 = vadd.f32 %v172_v39, %v142_v43  ;;  %v109_v52 = vsub.f32 %v97_v44, %v107_v45  ;;  %v161_v53 = vmul.f32 %v159_v46, %v529_v11  ;;  %v201_v54 = vrot.slane %v79_v30, %v186_v6 }
  0x59   :  { %v141_v55 = vsub.f32 %v129_v47, %v139_v48  ;;  %v171_v56 = vmul.f32 %v169_v49, %v537_v19  ;;  %v193_v57 = vmul.f32 %v191_v50, %v531_v12  ;;  %v112_v58 = vmul.f32 %v101_v14, %v525_v9 }
  0x5a   :  { %v206_v59 = vadd.f32 %v204_v40, %v174_v51  ;;  %v203_v60 = vmul.f32 %v201_v54, %v539_v24  ;;  %v114_v61 = vmul.f32 %v91_v13, %v533_v17  ;;  %v144_v62 = vmul.f32 %v133_v16, %v527_v10 }
  0x5b   :  { %v143_v63 = vadd.f32 %v141_v55, %v109_v52  ;;  %v173_v0 = vsub.f32 %v161_v53, %v171_v56  ;;  %v146_v1 = vmul.f32 %v123_v15, %v535_v18  ;;  %v176_v2 = vmul.f32 %v165_v21, %v529_v11 }
  0x5c   :  { %222 = vst.msk [vmem:[#allocation10] sm:$0xf] %vm221_vm1, %v206_v59  ;;  %v205_v3 = vsub.f32 %v193_v57, %v203_v60  ;;  %v116_v4 = vadd.f32 %v114_v61, %v112_v58  ;;  %v178_v5 = vmul.f32 %v155_v20, %v537_v19  ;;  %v208_v6 = vmul.f32 %v197_v23, %v531_v12 }
  0x5d   :  { %v175_v7 = vadd.f32 %v173_v0, %v143_v63  ;;  %v148_v8 = vadd.f32 %v146_v1, %v144_v62  ;;  %v210_v13 = vmul.f32 %v187_v22, %v539_v24  ;;  %v113_v14 = vmul.f32 %v105_v38, %v525_v9 }
  0x5e   :  { %v180_v16 = vadd.f32 %v178_v5, %v176_v2  ;;  %v115_v15 = vmul.f32 %v95_v37, %v533_v17  ;;  %v145_v21 = vmul.f32 %v137_v42, %v527_v10  ;;  %v147_v25 = vmul.f32 %v127_v41, %v535_v18 }
  0x5f   :  { %v207_v26 = vadd.f32 %v205_v3, %v175_v7  ;;  %v150_v27 = vadd.f32 %v148_v8, %v116_v4  ;;  %v212_v20 = vadd.f32 %v210_v13, %v208_v6  ;;  %v177_v23 = vmul.f32 %v169_v49, %v529_v11 }
  0x60   :  { %v117_v28 = vadd.f32 %v115_v15, %v113_v14  ;;  %v149_v29 = vadd.f32 %v147_v25, %v145_v21  ;;  %v179_v30 = vmul.f32 %v159_v46, %v537_v19  ;;  %v209_v22 = vmul.f32 %v201_v54, %v531_v12 }
  0x61   :  { %223 = vst.msk [vmem:[#allocation10 + $0x4] sm:$0xf] %vm221_vm1, %v207_v26  ;;  %v182_v9 = vadd.f32 %v180_v16, %v150_v27  ;;  %v211_v17 = vmul.f32 %v191_v50, %v539_v24 }
  0x62   :  { %v151_v10 = vadd.f32 %v149_v29, %v117_v28  ;;  %v181_v31 = vadd.f32 %v179_v30, %v177_v23 }
  0x63   :  { %369 = shalt.err (!%p366_p8)
}
  0x64   :  { %s370_s20 = scalar_lea.hbm %s611_s4, 128 }
  0x65   :  { %p371_p9 = scmp.ne.s32.totalorder %s611_s4, %s370_s20  ;;  %p374_p10 = scmp.lt.u32.totalorder %s370_s20, %s611_s4 }
  0x67   :  { %p376_p11 = pnand %p374_p10, %p371_p9 }
  0x69   :  { %379 = shalt.err (!%p376_p11)
}
  0x6a   :  { %237 = dma.vmem_to_hbm [thread:$0]  %s232_s1, 128, %s611_s4, [#allocation4], %s414_s30, %s414_s30, %s415_s6   ;;  %v214_v11 = vadd.f32 %v212_v20, %v182_v9  ;;  %v213_v12 = vadd.f32 %v211_v17, %v209_v22  ;;  %v183_v18 = vadd.f32 %v181_v31, %v151_v10 }
  0x6b   :  { %s420_s28 = smov [#allocation11]  }
  0x6c   :  { %s243_s29 = sshll.u32 %s420_s28, 4  ;;  %224 = vst.msk [vmem:[#allocation11] sm:$0xf] %vm221_vm1, %v214_v11  ;;  %v215_v19 = vadd.f32 %v213_v12, %v183_v18  ;;  %s244_s29 = int_to_ptr.vmem [resolvable:$true] %s243_s29 }
  0x6d   :  { %s380_s0 = scalar_lea.vmem %s244_s29, 128  ;;  %p385_p13 = scmp.lt.s32.totalorder %s244_s29, %s244_s29 }
  0x6e   :  { %225 = vst.msk [vmem:[#allocation11 + $0x4] sm:$0xf] %vm221_vm1, %v215_v19  ;;  %p381_p12 = scmp.ne.s32.totalorder %s244_s29, %s380_s0  ;;  %p386_p0 = scmp.lt.s32.totalorder %s380_s0, %s380_s0 }
  0x70   :  { %p387_p1 = por %p386_p0, %p385_p13 }
  0x72   :  { %p388_p2 = pnand %p387_p1, %p381_p12 }
  0x74   :  { %391 = shalt.err (!%p388_p2)
}
  0x75   :  { %s392_s7 = scalar_lea.hbm %s612_s5, 128 }
  0x76   :  { %p393_p3 = scmp.ne.s32.totalorder %s612_s5, %s392_s7  ;;  %p396_p4 = scmp.lt.u32.totalorder %s392_s7, %s612_s5 }
  0x78   :  { %p398_p5 = pnand %p396_p4, %p393_p3 }
  0x7a   :  { %401 = shalt.err (!%p398_p5)
}
  0x7b   :  { %249 = dma.vmem_to_hbm [thread:$0]  %s244_s29, 128, %s612_s5, [#allocation12], %s414_s30, %s414_s30, %s415_s6  }
  0x7c   :  { %408 = dma.done.wait [#allocation4], 128  }
  0x7d   :  { %409 = vsyncadd [#allocation4], 4294967168 }
  0x7e   :  { %410 = dma.done.wait [#allocation12], 128  }
  0x7f   :  { %411 = vsyncadd [#allocation12], 4294967168 }
  0x80   :  { %256 = vsyncpa [#allocation3], 1 }
  0x81   :  { %257 = vsyncpa [#allocation6], 1 }
  0x82   :  { %258 = vsyncpa [#allocation9], 1 }
  0x83   :  { %259 = vsyncpa [#allocation4], 1 }
  0x84   :  { %260 = vsyncpa [#allocation12], 1 }

</bundles_post_ra>
